<compile_context>
chip_gen: v6e
topology: v6e:2x2x1
jax: 0.10.0
libtpu: 0.0.40
codegen_flags: <defaults>
</compile_context>

<pallas_src>
import jax
import jax.numpy as jnp
from jax.experimental import pallas as pl
from jax.experimental.pallas import tpu as pltpu


def _round_up(x, m):
    return ((x + m - 1) // m) * m


def _pick_pb(n_planes, max_pb=8):
    """Largest plane-batch that divides n_planes, is <= max_pb, and still
    leaves >= 2 plane blocks (so v7x can shard the parallel axis across both
    TensorCores)."""
    candidates = [d for d in range(1, min(n_planes, max_pb) + 1)
                  if n_planes % d == 0 and n_planes // d >= 2]
    if candidates:
        return max(candidates)
    return n_planes  # n_planes == 1: nothing to split


def _bilinear_matrix(in_size, out_size, out_pad, dtype=jnp.float32):
    """(out_pad, in_size) interpolation matrix, PyTorch align_corners=False,
    antialias=False convention.  Built with a vectorized one-hot formulation
    (no scatters); rows beyond out_size are zero padding."""
    scale = in_size / out_size
    src = jnp.maximum(
        (jnp.arange(out_size, dtype=jnp.float32) + 0.5) * scale - 0.5, 0.0)
    i0 = jnp.floor(src).astype(jnp.int32)
    i1 = jnp.minimum(i0 + 1, in_size - 1)
    frac = src - i0.astype(jnp.float32)
    cols = jnp.arange(in_size, dtype=jnp.int32)[None, :]
    m = ((i0[:, None] == cols).astype(jnp.float32) * (1.0 - frac)[:, None]
         + (i1[:, None] == cols).astype(jnp.float32) * frac[:, None])
    if out_pad > out_size:
        m = jnp.pad(m, ((0, out_pad - out_size), (0, 0)))
    return m.astype(dtype)


def _resize_kernel(img_ref, wwt_ref, wh_ref, out_ref, tmp_ref):
    """One (plane-block, output-row-tile) grid step.

    img_ref : (PB, H, W)        PB source planes
    wwt_ref : (W, OWp)          column-interp weights (transposed, lane-dense)
    wh_ref  : (tile_oh, H)      row-interp weights for this output row tile
    out_ref : (PB, tile_oh, OWp)
    tmp_ref : (PB, H, OWp)      VMEM scratch: width pass, reused across row tiles
    """
    pb = img_ref.shape[0]

    # Width pass once per plane block (row-tile axis t is innermost).
    @pl.when(pl.program_id(1) == 0)
    def _():
        wwt = wwt_ref[...]
        for p in range(pb):
            tmp_ref[p] = jnp.dot(
                img_ref[p], wwt,
                preferred_element_type=jnp.float32).astype(tmp_ref.dtype)

    # Row pass for this output-row tile (lane-dense N = OWp on the MXU).
    wh = wh_ref[...]
    for p in range(pb):
        out_ref[p] = jnp.dot(
            wh, tmp_ref[p],
            preferred_element_type=jnp.float32).astype(out_ref.dtype)


def resize_forward(img, bboxes, size=128):
    """Pallas equivalent of Resize(size).forward(img, bboxes) on NCHW tensors."""
    N, C, H, W = img.shape

    # MXU path needs a float dtype (typical torchvision images are uint8).
    if not jnp.issubdtype(img.dtype, jnp.floating):
        img = img.astype(jnp.float32)
    compute_dtype = jnp.bfloat16 if img.dtype == jnp.bfloat16 else jnp.float32
    img = img.astype(compute_dtype)
    itemsize = jnp.dtype(compute_dtype).itemsize

    # Padded output geometry: lane-dense width, sublane-aligned row tiles.
    OWp = _round_up(size, 128)
    if size <= 512:
        tile_oh = _round_up(size, 8)
        OHp = tile_oh
    else:
        tile_oh = 256
        OHp = _round_up(size, tile_oh)
    n_row_tiles = OHp // tile_oh

    # Interpolation matrices (built once, resident in VMEM).
    wh = _bilinear_matrix(H, size, OHp, compute_dtype)        # (OHp, H)
    wwt = _bilinear_matrix(W, size, OWp, compute_dtype).T     # (W, OWp)

    # Batch planes per grid step to amortize per-step overhead.
    P = N * C
    PB = _pick_pb(P)
    n_plane_blocks = P // PB
    img3 = img.reshape(P, H, W)

    # VMEM budget: double-buffered blocks + persistent width-pass scratch.
    vmem_bytes = (2 * (PB * H * W + W * OWp + tile_oh * H + PB * tile_oh * OWp)
                  * itemsize + PB * H * OWp * itemsize)
    assert vmem_bytes < 48 * 1024 * 1024, (
        "plane block too large for VMEM (v7x has 64 MiB); reduce PB or tile H")
    cp_kwargs = dict(dimension_semantics=("parallel", "arbitrary"))
    if vmem_bytes > 24 * 1024 * 1024:
        cp_kwargs["vmem_limit_bytes"] = min(int(vmem_bytes * 3 // 2),
                                            56 * 1024 * 1024)

    flops = 2 * P * (H * W * OWp + OHp * H * OWp)
    bytes_accessed = (P * H * W + P * OHp * OWp) * itemsize

    out = pl.pallas_call(
        _resize_kernel,
        out_shape=jax.ShapeDtypeStruct((P, OHp, OWp), compute_dtype),
        grid=(n_plane_blocks, n_row_tiles),
        in_specs=[
            # PB source planes; constant across the row-tile axis (no re-DMA).
            pl.BlockSpec((PB, H, W), lambda pb, t: (pb, 0, 0)),
            # column-interp weights (same block every step)
            pl.BlockSpec((W, OWp), lambda pb, t: (0, 0)),
            # row-interp weights for this output row tile
            pl.BlockSpec((tile_oh, H), lambda pb, t: (t, 0)),
        ],
        out_specs=pl.BlockSpec((PB, tile_oh, OWp), lambda pb, t: (pb, t, 0)),
        scratch_shapes=[pltpu.VMEM((PB, H, OWp), compute_dtype)],
        compiler_params=pltpu.CompilerParams(**cp_kwargs),
        cost_estimate=pl.CostEstimate(flops=flops, transcendentals=0,
                                      bytes_accessed=bytes_accessed),
    )(img3, wwt, wh)

    img_out = out[:, :size, :size].reshape(N, C, size, size)

    # bbox rescale: tiny (nb, 4) elementwise op -> plain JAX in the wrapper.
    beta_w = size / W
    beta_h = size / H
    scale = jnp.array([beta_w, beta_h, beta_w, beta_h], dtype=bboxes.dtype)
    bboxes_out = bboxes * scale[None, :]

    return img_out, bboxes_out, [beta_w, beta_h, beta_w, beta_h]


def _reference_bilinear_resize(img, size):
    """Pure-JAX gather-based bilinear resize (align_corners=False, no AA)."""
    N, C, H, W = img.shape

    def coords(in_size):
        src = jnp.maximum(
            (jnp.arange(size, dtype=jnp.float32) + 0.5) * (in_size / size) - 0.5,
            0.0)
        i0 = jnp.floor(src).astype(jnp.int32)
        i1 = jnp.minimum(i0 + 1, in_size - 1)
        f = src - i0.astype(jnp.float32)
        return i0, i1, f

    y0, y1, fy = coords(H)
    x0, x1, fx = coords(W)
    fx = fx[None, None, None, :]
    fy = fy[None, None, :, None]

    top = img[:, :, y0, :][:, :, :, x0] * (1.0 - fx) + \
          img[:, :, y0, :][:, :, :, x1] * fx
    bot = img[:, :, y1, :][:, :, :, x0] * (1.0 - fx) + \
          img[:, :, y1, :][:, :, :, x1] * fx
    return top * (1.0 - fy) + bot * fy


if __name__ == "__main__":
    key = jax.random.PRNGKey(0)
    k_img, k_box = jax.random.split(key, 2)

    N, C, H, W = 2, 4, 16, 16
    nb = 8
    size = 128  # lane-dense (multiple of 128) output width

    img = jax.random.uniform(k_img, (N, C, H, W), dtype=jnp.float32)

    # synthetic boxes (x0, y0, x1, y1) with x0 < x1, y0 < y1 inside the image
    bx = jax.random.uniform(k_box, (nb, 4), dtype=jnp.float32)
    x0 = bx[:, 0:1] * (W / 2)
    y0 = bx[:, 1:2] * (H / 2)
    x1 = x0 + 1.0 + bx[:, 2:3] * (W / 2 - 1)
    y1 = y0 + 1.0 + bx[:, 3:4] * (H / 2 - 1)
    bboxes = jnp.concatenate([x0, y0, x1, y1], axis=1).astype(jnp.float32)

    img_out, bbox_out, betas = resize_forward(img, bboxes, size=size)
    jax.block_until_ready((img_out, bbox_out))

    # References
    ref_img = _reference_bilinear_resize(img, size)
    ref_box = bboxes * jnp.array([size / W, size / H, size / W, size / H],
                                 dtype=jnp.float32)[None, :]

    assert img_out.shape == (N, C, size, size), "bad output shape"
    assert jnp.allclose(img_out, ref_img, atol=1e-4), "image resize mismatch"
    assert jnp.allclose(bbox_out, ref_box, atol=1e-5), "bbox scale mismatch"
    assert betas == [size / W, size / H, size / W, size / H], "betas mismatch"
    print("KERNEL_OK")
</pallas_src>

<mosaic_0001>
module attributes {stable_mosaic.version = 11 : i64} {
  func.func @_resize_kernel(%arg0: i32, %arg1: i32, %arg2: memref<4x16x16xf32, #tpu.memory_space<vmem>>, %arg3: memref<16x128xf32, #tpu.memory_space<vmem>>, %arg4: memref<128x16xf32, #tpu.memory_space<vmem>>, %arg5: memref<4x128x128xf32, #tpu.memory_space<vmem>>, %arg6: memref<4x16x128xf32, #tpu.memory_space<vmem>>) attributes {dimension_semantics = [#tpu.dimension_semantics<parallel>, #tpu.dimension_semantics<arbitrary>], iteration_bounds = array<i64: 2, 1>, scalar_prefetch = 0 : i64, scratch_operands = 1 : i64, tpu.core_type = #tpu.core_type<tc>, window_params = [{transform_indices = @transform_0, window_bounds = array<i64: 4, 16, 16>}, {pipeline_mode = #tpu.pipeline_mode<synchronous>, transform_indices = @transform_1, window_bounds = array<i64: 16, 128>}, {transform_indices = @transform_2, window_bounds = array<i64: 128, 16>}, {transform_indices = @transform_3, window_bounds = array<i64: 4, 128, 128>}]} {
    %c0_i32 = arith.constant 0 : i32
    %0 = arith.cmpi eq, %arg1, %c0_i32 : i32
    %1 = arith.extui %0 : i1 to i32
    %c0_i32_0 = arith.constant 0 : i32
    %2 = arith.cmpi ne, %1, %c0_i32_0 : i32
    scf.if %2 {
      %c0_26 = arith.constant 0 : index
      %c0_27 = arith.constant 0 : index
      %28 = vector.load %arg3[%c0_26, %c0_27] : memref<16x128xf32, #tpu.memory_space<vmem>>, vector<16x128xf32>
      %c0_28 = arith.constant 0 : index
      %c0_29 = arith.constant 0 : index
      %c0_30 = arith.constant 0 : index
      %29 = vector.load %arg2[%c0_28, %c0_29, %c0_30] : memref<4x16x16xf32, #tpu.memory_space<vmem>>, vector<1x16x16xf32>
      %30 = vector.shape_cast %29 : vector<1x16x16xf32> to vector<16x16xf32>
      %cst_31 = arith.constant dense<0.000000e+00> : vector<16x128xf32>
      %31 = tpu.matmul %30, %28, %cst_31 {dimension_numbers = #tpu.dot_dimension_numbers<[1], [0], [0], [1], [0, 0, 1, 1], [], []>} : vector<16x16xf32>, vector<16x128xf32>, vector<16x128xf32> -> vector<16x128xf32>
      %c0_32 = arith.constant 0 : index
      %c0_33 = arith.constant 0 : index
      %c0_34 = arith.constant 0 : index
      %32 = vector.load %arg6[%c0_32, %c0_33, %c0_34] : memref<4x16x128xf32, #tpu.memory_space<vmem>>, vector<1x16x128xf32>
      %33 = vector.shape_cast %32 : vector<1x16x128xf32> to vector<16x128xf32>
      %34 = vector.shape_cast %31 : vector<16x128xf32> to vector<1x16x128xf32>
      tpu.vector_store %arg6[%c0_32, %c0_33, %c0_34], %34 {strides = array<i32>} : memref<4x16x128xf32, #tpu.memory_space<vmem>>, vector<1x16x128xf32>,
      %c1_35 = arith.constant 1 : index
      %c0_36 = arith.constant 0 : index
      %c0_37 = arith.constant 0 : index
      %35 = vector.load %arg2[%c1_35, %c0_36, %c0_37] : memref<4x16x16xf32, #tpu.memory_space<vmem>>, vector<1x16x16xf32>
      %36 = vector.shape_cast %35 : vector<1x16x16xf32> to vector<16x16xf32>
      %cst_38 = arith.constant dense<0.000000e+00> : vector<16x128xf32>
      %37 = tpu.matmul %36, %28, %cst_38 {dimension_numbers = #tpu.dot_dimension_numbers<[1], [0], [0], [1], [0, 0, 1, 1], [], []>} : vector<16x16xf32>, vector<16x128xf32>, vector<16x128xf32> -> vector<16x128xf32>
      %c1_39 = arith.constant 1 : index
      %c0_40 = arith.constant 0 : index
      %c0_41 = arith.constant 0 : index
      %38 = vector.load %arg6[%c1_39, %c0_40, %c0_41] : memref<4x16x128xf32, #tpu.memory_space<vmem>>, vector<1x16x128xf32>
      %39 = vector.shape_cast %38 : vector<1x16x128xf32> to vector<16x128xf32>
      %40 = vector.shape_cast %37 : vector<16x128xf32> to vector<1x16x128xf32>
      tpu.vector_store %arg6[%c1_39, %c0_40, %c0_41], %40 {strides = array<i32>} : memref<4x16x128xf32, #tpu.memory_space<vmem>>, vector<1x16x128xf32>,
      %c2_42 = arith.constant 2 : index
      %c0_43 = arith.constant 0 : index
      %c0_44 = arith.constant 0 : index
      %41 = vector.load %arg2[%c2_42, %c0_43, %c0_44] : memref<4x16x16xf32, #tpu.memory_space<vmem>>, vector<1x16x16xf32>
      %42 = vector.shape_cast %41 : vector<1x16x16xf32> to vector<16x16xf32>
      %cst_45 = arith.constant dense<0.000000e+00> : vector<16x128xf32>
      %43 = tpu.matmul %42, %28, %cst_45 {dimension_numbers = #tpu.dot_dimension_numbers<[1], [0], [0], [1], [0, 0, 1, 1], [], []>} : vector<16x16xf32>, vector<16x128xf32>, vector<16x128xf32> -> vector<16x128xf32>
      %c2_46 = arith.constant 2 : index
      %c0_47 = arith.constant 0 : index
      %c0_48 = arith.constant 0 : index
      %44 = vector.load %arg6[%c2_46, %c0_47, %c0_48] : memref<4x16x128xf32, #tpu.memory_space<vmem>>, vector<1x16x128xf32>
      %45 = vector.shape_cast %44 : vector<1x16x128xf32> to vector<16x128xf32>
      %46 = vector.shape_cast %43 : vector<16x128xf32> to vector<1x16x128xf32>
      tpu.vector_store %arg6[%c2_46, %c0_47, %c0_48], %46 {strides = array<i32>} : memref<4x16x128xf32, #tpu.memory_space<vmem>>, vector<1x16x128xf32>,
      %c3_49 = arith.constant 3 : index
      %c0_50 = arith.constant 0 : index
      %c0_51 = arith.constant 0 : index
      %47 = vector.load %arg2[%c3_49, %c0_50, %c0_51] : memref<4x16x16xf32, #tpu.memory_space<vmem>>, vector<1x16x16xf32>
      %48 = vector.shape_cast %47 : vector<1x16x16xf32> to vector<16x16xf32>
      %cst_52 = arith.constant dense<0.000000e+00> : vector<16x128xf32>
      %49 = tpu.matmul %48, %28, %cst_52 {dimension_numbers = #tpu.dot_dimension_numbers<[1], [0], [0], [1], [0, 0, 1, 1], [], []>} : vector<16x16xf32>, vector<16x128xf32>, vector<16x128xf32> -> vector<16x128xf32>
      %c3_53 = arith.constant 3 : index
      %c0_54 = arith.constant 0 : index
      %c0_55 = arith.constant 0 : index
      %50 = vector.load %arg6[%c3_53, %c0_54, %c0_55] : memref<4x16x128xf32, #tpu.memory_space<vmem>>, vector<1x16x128xf32>
      %51 = vector.shape_cast %50 : vector<1x16x128xf32> to vector<16x128xf32>
      %52 = vector.shape_cast %49 : vector<16x128xf32> to vector<1x16x128xf32>
      tpu.vector_store %arg6[%c3_53, %c0_54, %c0_55], %52 {strides = array<i32>} : memref<4x16x128xf32, #tpu.memory_space<vmem>>, vector<1x16x128xf32>,
    } else {
    }
    %c0 = arith.constant 0 : index
    %c0_1 = arith.constant 0 : index
    %3 = vector.load %arg4[%c0, %c0_1] : memref<128x16xf32, #tpu.memory_space<vmem>>, vector<128x16xf32>
    %c0_2 = arith.constant 0 : index
    %c0_3 = arith.constant 0 : index
    %c0_4 = arith.constant 0 : index
    %4 = vector.load %arg6[%c0_2, %c0_3, %c0_4] : memref<4x16x128xf32, #tpu.memory_space<vmem>>, vector<1x16x128xf32>
    %5 = vector.shape_cast %4 : vector<1x16x128xf32> to vector<16x128xf32>
    %cst = arith.constant dense<0.000000e+00> : vector<128x128xf32>
    %6 = tpu.matmul %3, %5, %cst {dimension_numbers = #tpu.dot_dimension_numbers<[1], [0], [0], [1], [0, 0, 1, 1], [], []>} : vector<128x16xf32>, vector<16x128xf32>, vector<128x128xf32> -> vector<128x128xf32>
    %c0_5 = arith.constant 0 : index
    %c0_6 = arith.constant 0 : index
    %c0_7 = arith.constant 0 : index
    %7 = vector.load %arg5[%c0_5, %c0_6, %c0_7] : memref<4x128x128xf32, #tpu.memory_space<vmem>>, vector<1x128x128xf32>
    %8 = vector.shape_cast %7 : vector<1x128x128xf32> to vector<128x128xf32>
    %9 = vector.shape_cast %6 : vector<128x128xf32> to vector<1x128x128xf32>
    tpu.vector_store %arg5[%c0_5, %c0_6, %c0_7], %9 {strides = array<i32>} : memref<4x128x128xf32, #tpu.memory_space<vmem>>, vector<1x128x128xf32>,
    %c1 = arith.constant 1 : index
    %c0_8 = arith.constant 0 : index
    %c0_9 = arith.constant 0 : index
    %10 = vector.load %arg6[%c1, %c0_8, %c0_9] : memref<4x16x128xf32, #tpu.memory_space<vmem>>, vector<1x16x128xf32>
    %11 = vector.shape_cast %10 : vector<1x16x128xf32> to vector<16x128xf32>
    %cst_10 = arith.constant dense<0.000000e+00> : vector<128x128xf32>
    %12 = tpu.matmul %3, %11, %cst_10 {dimension_numbers = #tpu.dot_dimension_numbers<[1], [0], [0], [1], [0, 0, 1, 1], [], []>} : vector<128x16xf32>, vector<16x128xf32>, vector<128x128xf32> -> vector<128x128xf32>
    %c1_11 = arith.constant 1 : index
    %c0_12 = arith.constant 0 : index
    %c0_13 = arith.constant 0 : index
    %13 = vector.load %arg5[%c1_11, %c0_12, %c0_13] : memref<4x128x128xf32, #tpu.memory_space<vmem>>, vector<1x128x128xf32>
    %14 = vector.shape_cast %13 : vector<1x128x128xf32> to vector<128x128xf32>
    %15 = vector.shape_cast %12 : vector<128x128xf32> to vector<1x128x128xf32>
    tpu.vector_store %arg5[%c1_11, %c0_12, %c0_13], %15 {strides = array<i32>} : memref<4x128x128xf32, #tpu.memory_space<vmem>>, vector<1x128x128xf32>,
    %c2 = arith.constant 2 : index
    %c0_14 = arith.constant 0 : index
    %c0_15 = arith.constant 0 : index
    %16 = vector.load %arg6[%c2, %c0_14, %c0_15] : memref<4x16x128xf32, #tpu.memory_space<vmem>>, vector<1x16x128xf32>
    %17 = vector.shape_cast %16 : vector<1x16x128xf32> to vector<16x128xf32>
    %cst_16 = arith.constant dense<0.000000e+00> : vector<128x128xf32>
    %18 = tpu.matmul %3, %17, %cst_16 {dimension_numbers = #tpu.dot_dimension_numbers<[1], [0], [0], [1], [0, 0, 1, 1], [], []>} : vector<128x16xf32>, vector<16x128xf32>, vector<128x128xf32> -> vector<128x128xf32>
    %c2_17 = arith.constant 2 : index
    %c0_18 = arith.constant 0 : index
    %c0_19 = arith.constant 0 : index
    %19 = vector.load %arg5[%c2_17, %c0_18, %c0_19] : memref<4x128x128xf32, #tpu.memory_space<vmem>>, vector<1x128x128xf32>
    %20 = vector.shape_cast %19 : vector<1x128x128xf32> to vector<128x128xf32>
    %21 = vector.shape_cast %18 : vector<128x128xf32> to vector<1x128x128xf32>
    tpu.vector_store %arg5[%c2_17, %c0_18, %c0_19], %21 {strides = array<i32>} : memref<4x128x128xf32, #tpu.memory_space<vmem>>, vector<1x128x128xf32>,
    %c3 = arith.constant 3 : index
    %c0_20 = arith.constant 0 : index
    %c0_21 = arith.constant 0 : index
    %22 = vector.load %arg6[%c3, %c0_20, %c0_21] : memref<4x16x128xf32, #tpu.memory_space<vmem>>, vector<1x16x128xf32>
    %23 = vector.shape_cast %22 : vector<1x16x128xf32> to vector<16x128xf32>
    %cst_22 = arith.constant dense<0.000000e+00> : vector<128x128xf32>
    %24 = tpu.matmul %3, %23, %cst_22 {dimension_numbers = #tpu.dot_dimension_numbers<[1], [0], [0], [1], [0, 0, 1, 1], [], []>} : vector<128x16xf32>, vector<16x128xf32>, vector<128x128xf32> -> vector<128x128xf32>
    %c3_23 = arith.constant 3 : index
    %c0_24 = arith.constant 0 : index
    %c0_25 = arith.constant 0 : index
    %25 = vector.load %arg5[%c3_23, %c0_24, %c0_25] : memref<4x128x128xf32, #tpu.memory_space<vmem>>, vector<1x128x128xf32>
    %26 = vector.shape_cast %25 : vector<1x128x128xf32> to vector<128x128xf32>
    %27 = vector.shape_cast %24 : vector<128x128xf32> to vector<1x128x128xf32>
    tpu.vector_store %arg5[%c3_23, %c0_24, %c0_25], %27 {strides = array<i32>} : memref<4x128x128xf32, #tpu.memory_space<vmem>>, vector<1x128x128xf32>,
    return
  }
  func.func @transform_0(%arg0: i32, %arg1: i32) -> (i32, i32, i32) {
    %c0_i32 = arith.constant 0 : i32
    %c0_i32_0 = arith.constant 0 : i32
    %c0_i32_1 = arith.constant 0 : i32
    return %arg0, %c0_i32, %c0_i32_0 : i32, i32, i32
  }
  func.func @transform_1(%arg0: i32, %arg1: i32) -> (i32, i32) {
    %c0_i32 = arith.constant 0 : i32
    %c0_i32_0 = arith.constant 0 : i32
    %c0_i32_1 = arith.constant 0 : i32
    return %c0_i32, %c0_i32_0 : i32, i32
  }
  func.func @transform_2(%arg0: i32, %arg1: i32) -> (i32, i32) {
    %c0_i32 = arith.constant 0 : i32
    %c0_i32_0 = arith.constant 0 : i32
    return %arg1, %c0_i32 : i32, i32
  }
  func.func @transform_3(%arg0: i32, %arg1: i32) -> (i32, i32, i32) {
    %c0_i32 = arith.constant 0 : i32
    %c0_i32_0 = arith.constant 0 : i32
    return %arg0, %arg1, %c0_i32 : i32, i32, i32
  }
}

</mosaic_0001>

<bundles_post_ra>
// kernel: tpu_custom_call.1
= control target key start
LH: loop header
LB: loop body
LE: loop exit
PB: predicated region body
PF: predicated region fallthrough
CT: control target
= control target key end

     0   :  { %8 = vsyncpa [#allocation4], 0  ;;  %s2246_s0 = inlined_call_operand.vmem [shape: f32[8,16,16], index: 0, kind: input, shape index: {}]   ;;  %s2247_s1 = inlined_call_operand.vmem [shape: f32[16,128], index: 1, kind: input, shape index: {}]   ;;  %s2248_s2 = inlined_call_operand.vmem [shape: f32[128,16], index: 2, kind: input, shape index: {}]   ;;  %s2249_s3 = inlined_call_operand.hbm [shape: f32[8,128,128], index: 3, kind: output, shape index: {}]  }
   0x1   :  { %10 = vsyncpa [#allocation4 + $0x1], 0  ;;  %s1924_s12 = smov 0   ;;  %s1926_s13 = smov 0  }
   0x2   :  { %s1928_s14 = smov 0   ;;  %s1930_s15 = smov 0  }
   0x3   :  { %s1932_s16 = smov 0   ;;  %s1934_s17 = smov 0  }
   0x4 LB: > { %s1393_s18 = sadd.s32 4294967295, %s1899_s17   ;;  %s1394_s19 = sadd.s32 4294967294, %s1899_s17   ;;  %s1899_s17 = sphi %s1934_s17, %s16_s17   ;;  %s1895_s16 = sphi %s1932_s16, %s2256_s16   ;;  %s1891_s15 = sphi %s1930_s15, %s2255_s15   ;;  %s1887_s14 = sphi %s1928_s14, %s2254_s14   ;;  %s1883_s13 = sphi %s1926_s13, %s2253_s13   ;;  %s1879_s12 = sphi %s1924_s12, %s2252_s12  }
   0x5   : > { %s28_s20 = sadd.s32 1, %s1895_s16  ;;  %s110_s21 = sadd.s32 1, %s1887_s14 }
   0x6   : > { %p30_p0 = scmp.ge.s32.totalorder %s28_s20, 2  ;;  %p120_p1 = scmp.ne.s32.totalorder %s1887_s14, %s1883_s13 }
   0x7   : > { %p121_p2 = scmp.eq.s32.totalorder %s1393_s18, 1  ;;  %p126_p3 = scmp.ne.s32.totalorder %s1883_s13, %s1879_s12 }
   0x8   : > { %s2258_s20 = smov (%p30_p0, %s28_s20), 0  ;;  %p127_p5 = scmp.eq.s32.totalorder %s1394_s19, 1 }
   0x9   : > { %p1964_p4 = por %p121_p2, %p120_p1  ;;  %s105_s23 = ssub.s32 %s1895_s16, %s2258_s20 }
   0xa   : > { %p1398_p6 = scmp.ge.s32.totalorder %s1899_s17, 1  ;;  %p108_p7 = scmp.eq.s32.totalorder %s105_s23, 0 }
   0xb   : > { %p1971_p8 = por %p127_p5, %p126_p3  ;;  %p167_p9 = scmp.lt.s32.totalorder %s1899_s17, 3 }
   0xc   : > { %s1977_s25 = scalar_select %p108_p7, %s1887_s14, %s110_s21  }
   0xd   : > { %p168_p10 = pnand %p1398_p6, %p167_p9 }
   0xe   : > { %s1400_s30 = sshll.u32 (!%p168_p10), %s1891_s15, 2  ;;  %s194_s6 = sand.u32 (!%p168_p10), 1, %s1883_s13  }
   0xf   : > { %171 = sbr.rel (%p168_p10) target bundleno = 495 (0x1ef), region = 32  ;;  %p198_p11 = scmp.lt.s32.totalorder (!%p168_p10), %s1400_s30, 7 }
  0x10   : > { %s1537_s9 = sshll.u32 (!%p168_p10), %s1891_s15, 13  ;;  %s2201_s15 = scalar_lea.sflag (!%p168_p10), [#allocation4], %s194_s6 }
  0x11   : > { %s2191_s19 = scalar_lea.hbm (!%p168_p10), %s2249_s3, %s1537_s9  ;;  %s1901_s23 = smov (!%p168_p10), [#allocation3]  }
  0x12   : > { %s1827_s26 = sshll.u32 (!%p168_p10), %s1901_s23, 4  ;;  %s1828_s26 = int_to_ptr.vmem [resolvable:$false] %s1827_s26 }
  0x13   : > { %s1829_s27 = scalar_lea.vmem (!%p168_p10), %s1828_s26, 16384 }
  0x14   : > { %v217_v0 = vld [vmem:[%s2247_s1 + $0x8] sm:$0xff]  ;;  %v216_v1 = vld [vmem:[%s2247_s1] sm:$0xff]  ;;  %s2260_s30 = smov (!%p198_p11, %s1400_s30), 7  ;;  %vm220_vm0 = vcmask 130048   ;;  %v567_v18 = vld [vmem:[%s2248_s2 + $0x10] sm:$0xff] }
  0x15   : > { %1626 = vmatprep.subr.mxu0 %v217_v0  ;;  %1633 = vmatprep.subr.mxu1 %v217_v0  ;;  %s1535_s4 = sshll.u32 %s2260_s30, 4  ;;  %v2000_v10 = vld [vmem:[%s2248_s2] sm:$0xff]  ;;  %v2009_v15 = vld [vmem:[%s2248_s2 + $0x8] sm:$0xff]  ;;  %v568_v21 = vld [vmem:[%s2248_s2 + $0x18] sm:$0xff] }
  0x16   : > { %1627 = vmatpush3.msra.mxu0 %v217_v0  ;;  %1634 = vmatpush3.msra.mxu1 %v217_v0  ;;  %s202_s7 = scalar_lea.vmem %s2246_s0, %s1535_s4  ;;  %v569_v22 = vld [vmem:[%s2248_s2 + $0x20] sm:$0xff]  ;;  %v570_v23 = vld [vmem:[%s2248_s2 + $0x28] sm:$0xff]  ;;  %v571_v24 = vld [vmem:[%s2248_s2 + $0x30] sm:$0xff] }
  0x17   : > { %1628 = vmatprep.subr.mxu0 %v216_v1  ;;  %1635 = vmatprep.subr.mxu1 %v216_v1  ;;  %v218_v2 = vld [vmem:[%s202_s7] sm:$0xff]  ;;  %v1405_v3 = vld [vmem:[%s202_s7 + $0x10] sm:$0xff]  ;;  %v219_v4 = vld [vmem:[%s202_s7 + $0x8] sm:$0xff] }
  0x18   : > { %1629 = vmatpush3.msra.mxu0 %v216_v1  ;;  %1636 = vmatpush3.msra.mxu1 %v216_v1  ;;  %v1406_v5 = vld [vmem:[%s202_s7 + $0x18] sm:$0xff]  ;;  %v1409_v6 = vld [vmem:[%s202_s7 + $0x20] sm:$0xff]  ;;  %v1413_v7 = vld [vmem:[%s202_s7 + $0x30] sm:$0xff] }
  0x19   : > { %1640 = vmatprep.subr.mxu0 %v217_v0  ;;  %1647 = vmatprep.subr.mxu1 %v217_v0  ;;  %v1410_v8 = vld [vmem:[%s202_s7 + $0x28] sm:$0xff]  ;;  %v1414_v9 = vld [vmem:[%s202_s7 + $0x38] sm:$0xff]  ;;  %v573_v26 = vld [vmem:[%s2248_s2 + $0x40] sm:$0xff]  ;;  %s1399_s7 = sshll.u32 %s194_s6, 9 }
  0x1a   : > { %1630 = vmatprep.mubr.msk.f32.mxu0 %vm220_vm0, %v218_v2  ;;  %1637 = vmatprep.mubr.msk.f32.mxu1 %vm220_vm0, %v1405_v3  ;;  %v572_v25 = vld [vmem:[%s2248_s2 + $0x38] sm:$0xff]  ;;  %v574_v27 = vld [vmem:[%s2248_s2 + $0x48] sm:$0xff]  ;;  %v575_v28 = vld [vmem:[%s2248_s2 + $0x50] sm:$0xff]  ;;  %s2124_s8 = scalar_lea.vmem [#allocation3], %s1399_s7 }
  0x1b   : > { %1631 = vmatmul.mubr.msk.f32.vlgmr.msra.gmra.mxu0 %vm220_vm0, %v219_v4  ;;  %1638 = vmatmul.mubr.msk.f32.vlgmr.msra.gmra.mxu1 %vm220_vm0, %v1406_v5  ;;  %v576_v29 = vld [vmem:[%s2248_s2 + $0x58] sm:$0xff]  ;;  %v577_v30 = vld [vmem:[%s2248_s2 + $0x60] sm:$0xff]  ;;  %v578_v31 = vld [vmem:[%s2248_s2 + $0x68] sm:$0xff]  ;;  %s1305_s10 = sshll.u32 %s2124_s8, 4  ;;  %s2193_s10 = int_to_ptr.vmem [resolvable:$true] %s1305_s10 }
  0x1c   : > { %1641 = vmatpush3.msra.mxu0 %v217_v0  ;;  %1648 = vmatpush3.msra.mxu1 %v217_v0  ;;  %v579_v32 = vld [vmem:[%s2248_s2 + $0x70] sm:$0xff]  ;;  %v580_v33 = vld [vmem:[%s2248_s2 + $0x78] sm:$0xff]  ;;  %s1823_s21 = scalar_lea.vmem %s2193_s10, 8192  ;;  %p1830_p1 = scmp.lt.s32.totalorder %s2193_s10, %s1828_s26 }
  0x1d   : > { %1642 = vmatprep.subr.mxu0 %v216_v1  ;;  %1649 = vmatprep.subr.mxu1 %v216_v1  ;;  %p1824_p12 = scmp.ne.s32.totalorder %s2193_s10, %s1823_s21  ;;  %p1831_p2 = scmp.lt.s32.totalorder %s1829_s27, %s1823_s21 }
  0x1e   : > { %1643 = vmatpush3.msra.mxu0 %v216_v1  ;;  %1644 = vmatprep.mubr.msk.f32.mxu0 %vm220_vm0, %v1409_v6 }
  0x1f   : > { %1650 = vmatpush3.msra.mxu1 %v216_v1  ;;  %1651 = vmatprep.mubr.msk.f32.mxu1 %vm220_vm0, %v1413_v7  ;;  %p1825_p13 = pnand %p1824_p12, %p1964_p4  ;;  %p1832_p3 = por %p1831_p2, %p1830_p1 }
  0x20   : > { %1645 = vmatmul.mubr.msk.f32.vlgmr.msra.gmra.mxu0 %vm220_vm0, %v1410_v8  ;;  %1652 = vmatmul.mubr.msk.f32.vlgmr.msra.gmra.mxu1 %vm220_vm0, %v1414_v9 }
  0x21   : > { %1658 = vmatprep.mubr.msk.f32.mxu0 %vm220_vm0, %v2000_v10  ;;  %1686 = vmatprep.mubr.msk.f32.mxu1 %vm220_vm0, %v2000_v10  ;;  %p1826_p0 = pneg %p1825_p13 }
  0x23   : > { %p1833_p5 = pnand %p1832_p3, %p1826_p0 }
  0xdb   : > { %v1632_v11 = vpop.f32.mrf.mxu0  ;;  %v1639_v12 = vpop.f32.mrf.mxu1 }
  0xdc   : > { %1654 = vmatprep.subr.mxu0 %v1632_v11  ;;  %1682 = vmatprep.subr.mxu1 %v1639_v12 }
  0xdd   : > { %v293_v13 = vpop.f32.mrf.mxu0  ;;  %v379_v14 = vpop.f32.mrf.mxu1  ;;  %1655 = vmatpush3.msra.mxu0 %v1632_v11  ;;  %1683 = vmatpush3.msra.mxu1 %v1639_v12 }
  0xde   : > { %1656 = vmatprep.subr.mxu0 %v293_v13  ;;  %1684 = vmatprep.subr.mxu1 %v379_v14 }
  0xdf   : > { %1657 = vmatpush3.msra.mxu0 %v293_v13  ;;  %1685 = vmatpush3.msra.mxu1 %v379_v14 }
  0xe0   : > { %v1646_v16 = vpop.f32.mrf.mxu0  ;;  %v1653_v17 = vpop.f32.mrf.mxu1  ;;  %1659 = vmatmul.mubr.msk.f32.vlgmr.msra.gmra.mxu0 %vm220_vm0, %v2009_v15  ;;  %1687 = vmatmul.mubr.msk.f32.vlgmr.msra.gmra.mxu1 %vm220_vm0, %v2009_v15 }
  0xe1   : > { %1710 = vmatprep.subr.mxu0 %v1646_v16  ;;  %1738 = vmatprep.subr.mxu1 %v1653_v17 }
  0xe2   : > { %v466_v19 = vpop.f32.mrf.mxu0  ;;  %v553_v20 = vpop.f32.mrf.mxu1  ;;  %1711 = vmatpush3.msra.mxu0 %v1646_v16  ;;  %1739 = vmatpush3.msra.mxu1 %v1653_v17 }
  0xe3   : > { %1712 = vmatprep.subr.mxu0 %v466_v19  ;;  %1740 = vmatprep.subr.mxu1 %v553_v20 }
  0xe4   : > { %1661 = vmatprep.mubr.msk.f32.mxu0 %vm220_vm0, %v567_v18  ;;  %1689 = vmatprep.mubr.msk.f32.mxu1 %vm220_vm0, %v567_v18 }
  0xe5   : > { %1713 = vmatpush3.msra.mxu0 %v466_v19  ;;  %1741 = vmatpush3.msra.mxu1 %v553_v20 }
  0xe6   : > { %1662 = vmatmul.mubr.msk.f32.gmra.mxu0 %vm220_vm0, %v568_v21  ;;  %1690 = vmatmul.mubr.msk.f32.gmra.mxu1 %vm220_vm0, %v568_v21 }
  0xe7   : > { %1664 = vmatprep.mubr.msk.f32.mxu0 %vm220_vm0, %v569_v22  ;;  %1692 = vmatprep.mubr.msk.f32.mxu1 %vm220_vm0, %v569_v22 }
  0xea   : > { %1665 = vmatmul.mubr.msk.f32.gmra.mxu0 %vm220_vm0, %v570_v23  ;;  %1693 = vmatmul.mubr.msk.f32.gmra.mxu1 %vm220_vm0, %v570_v23 }
  0xeb   : > { %1667 = vmatprep.mubr.msk.f32.mxu0 %vm220_vm0, %v571_v24  ;;  %1695 = vmatprep.mubr.msk.f32.mxu1 %vm220_vm0, %v571_v24 }
  0xee   : > { %1668 = vmatmul.mubr.msk.f32.gmra.mxu0 %vm220_vm0, %v572_v25  ;;  %1696 = vmatmul.mubr.msk.f32.gmra.mxu1 %vm220_vm0, %v572_v25 }
  0xef   : > { %1670 = vmatprep.mubr.msk.f32.mxu0 %vm220_vm0, %v573_v26  ;;  %1698 = vmatprep.mubr.msk.f32.mxu1 %vm220_vm0, %v573_v26 }
  0xf2   : > { %1671 = vmatmul.mubr.msk.f32.gmra.mxu0 %vm220_vm0, %v574_v27  ;;  %1699 = vmatmul.mubr.msk.f32.gmra.mxu1 %vm220_vm0, %v574_v27 }
  0xf3   : > { %1673 = vmatprep.mubr.msk.f32.mxu0 %vm220_vm0, %v575_v28  ;;  %1701 = vmatprep.mubr.msk.f32.mxu1 %vm220_vm0, %v575_v28 }
  0xf6   : > { %1674 = vmatmul.mubr.msk.f32.gmra.mxu0 %vm220_vm0, %v576_v29  ;;  %1702 = vmatmul.mubr.msk.f32.gmra.mxu1 %vm220_vm0, %v576_v29 }
  0xf7   : > { %1676 = vmatprep.mubr.msk.f32.mxu0 %vm220_vm0, %v577_v30  ;;  %1704 = vmatprep.mubr.msk.f32.mxu1 %vm220_vm0, %v577_v30 }
  0xfa   : > { %1677 = vmatmul.mubr.msk.f32.gmra.mxu0 %vm220_vm0, %v578_v31  ;;  %1705 = vmatmul.mubr.msk.f32.gmra.mxu1 %vm220_vm0, %v578_v31 }
  0xfb   : > { %1679 = vmatprep.mubr.msk.f32.mxu0 %vm220_vm0, %v579_v32  ;;  %1707 = vmatprep.mubr.msk.f32.mxu1 %vm220_vm0, %v579_v32 }
  0xfe   : > { %1680 = vmatmul.mubr.msk.f32.gmra.mxu0 %vm220_vm0, %v580_v33  ;;  %1708 = vmatmul.mubr.msk.f32.gmra.mxu1 %vm220_vm0, %v580_v33 }
  0xff   : > { %1714 = vmatprep.mubr.msk.f32.mxu0 %vm220_vm0, %v2000_v10  ;;  %1742 = vmatprep.mubr.msk.f32.mxu1 %vm220_vm0, %v2000_v10 }
 0x102   : > { %1715 = vmatmul.mubr.msk.f32.vlgmr.msra.gmra.mxu0 %vm220_vm0, %v2009_v15  ;;  %1743 = vmatmul.mubr.msk.f32.vlgmr.msra.gmra.mxu1 %vm220_vm0, %v2009_v15 }
 0x103   : > { %1717 = vmatprep.mubr.msk.f32.mxu0 %vm220_vm0, %v567_v18  ;;  %1745 = vmatprep.mubr.msk.f32.mxu1 %vm220_vm0, %v567_v18 }
 0x106   : > { %1718 = vmatmul.mubr.msk.f32.gmra.mxu0 %vm220_vm0, %v568_v21  ;;  %1746 = vmatmul.mubr.msk.f32.gmra.mxu1 %vm220_vm0, %v568_v21 }
 0x107   : > { %1720 = vmatprep.mubr.msk.f32.mxu0 %vm220_vm0, %v569_v22  ;;  %1748 = vmatprep.mubr.msk.f32.mxu1 %vm220_vm0, %v569_v22 }
 0x10a   : > { %1721 = vmatmul.mubr.msk.f32.gmra.mxu0 %vm220_vm0, %v570_v23  ;;  %1749 = vmatmul.mubr.msk.f32.gmra.mxu1 %vm220_vm0, %v570_v23 }
 0x10b   : > { %1723 = vmatprep.mubr.msk.f32.mxu0 %vm220_vm0, %v571_v24  ;;  %1751 = vmatprep.mubr.msk.f32.mxu1 %vm220_vm0, %v571_v24 }
 0x10e   : > { %1724 = vmatmul.mubr.msk.f32.gmra.mxu0 %vm220_vm0, %v572_v25  ;;  %1752 = vmatmul.mubr.msk.f32.gmra.mxu1 %vm220_vm0, %v572_v25 }
 0x10f   : > { %1726 = vmatprep.mubr.msk.f32.mxu0 %vm220_vm0, %v573_v26  ;;  %1754 = vmatprep.mubr.msk.f32.mxu1 %vm220_vm0, %v573_v26 }
 0x112   : > { %1727 = vmatmul.mubr.msk.f32.gmra.mxu0 %vm220_vm0, %v574_v27  ;;  %1755 = vmatmul.mubr.msk.f32.gmra.mxu1 %vm220_vm0, %v574_v27 }
 0x113   : > { %1729 = vmatprep.mubr.msk.f32.mxu0 %vm220_vm0, %v575_v28  ;;  %1757 = vmatprep.mubr.msk.f32.mxu1 %vm220_vm0, %v575_v28 }
 0x116   : > { %1730 = vmatmul.mubr.msk.f32.gmra.mxu0 %vm220_vm0, %v576_v29  ;;  %1758 = vmatmul.mubr.msk.f32.gmra.mxu1 %vm220_vm0, %v576_v29 }
 0x117   : > { %1732 = vmatprep.mubr.msk.f32.mxu0 %vm220_vm0, %v577_v30  ;;  %1760 = vmatprep.mubr.msk.f32.mxu1 %vm220_vm0, %v577_v30 }
 0x11a   : > { %1733 = vmatmul.mubr.msk.f32.gmra.mxu0 %vm220_vm0, %v578_v31  ;;  %1761 = vmatmul.mubr.msk.f32.gmra.mxu1 %vm220_vm0, %v578_v31 }
 0x11b   : > { %1735 = vmatprep.mubr.msk.f32.mxu0 %vm220_vm0, %v579_v32  ;;  %1763 = vmatprep.mubr.msk.f32.mxu1 %vm220_vm0, %v579_v32 }
 0x11e   : > { %1736 = vmatmul.mubr.msk.f32.gmra.mxu0 %vm220_vm0, %v580_v33  ;;  %1764 = vmatmul.mubr.msk.f32.gmra.mxu1 %vm220_vm0, %v580_v33 }
 0x1a0   : > { %v1660_v34 = vpop.f32.mrf.mxu0  ;;  %v1688_v35 = vpop.f32.mrf.mxu1 }
 0x1a1   : > { %778 = vst [vmem:[%s2124_s8 + $0x8] sm:$0xff] %v1660_v34  ;;  %1450 = vst [vmem:[%s2124_s8 + $0x88] sm:$0xff] %v1688_v35 }
 0x1a2   : > { %v698_v36 = vpop.f32.mrf.mxu0  ;;  %v862_v37 = vpop.f32.mrf.mxu1 }
 0x1a3   : > { %777 = vst [vmem:[%s2124_s8] sm:$0xff] %v698_v36  ;;  %1449 = vst [vmem:[%s2124_s8 + $0x80] sm:$0xff] %v862_v37 }
 0x1a6   : > { %v1663_v38 = vpop.f32.mrf.mxu0  ;;  %v1691_v39 = vpop.f32.mrf.mxu1 }
 0x1a7   : > { %780 = vst [vmem:[%s2124_s8 + $0x18] sm:$0xff] %v1663_v38  ;;  %1452 = vst [vmem:[%s2124_s8 + $0x98] sm:$0xff] %v1691_v39 }
 0x1a8   : > { %v708_v40 = vpop.f32.mrf.mxu0  ;;  %v872_v41 = vpop.f32.mrf.mxu1 }
 0x1a9   : > { %779 = vst [vmem:[%s2124_s8 + $0x10] sm:$0xff] %v708_v40  ;;  %1451 = vst [vmem:[%s2124_s8 + $0x90] sm:$0xff] %v872_v41 }
 0x1aa   : > { %v1666_v42 = vpop.f32.mrf.mxu0  ;;  %v1694_v43 = vpop.f32.mrf.mxu1 }
 0x1ab   : > { %782 = vst [vmem:[%s2124_s8 + $0x28] sm:$0xff] %v1666_v42  ;;  %1454 = vst [vmem:[%s2124_s8 + $0xa8] sm:$0xff] %v1694_v43 }
 0x1ac   : > { %v718_v44 = vpop.f32.mrf.mxu0  ;;  %v882_v45 = vpop.f32.mrf.mxu1 }
 0x1ad   : > { %781 = vst [vmem:[%s2124_s8 + $0x20] sm:$0xff] %v718_v44  ;;  %1453 = vst [vmem:[%s2124_s8 + $0xa0] sm:$0xff] %v882_v45 }
 0x1ae   : > { %v1669_v46 = vpop.f32.mrf.mxu0  ;;  %v1697_v47 = vpop.f32.mrf.mxu1 }
 0x1af   : > { %784 = vst [vmem:[%s2124_s8 + $0x38] sm:$0xff] %v1669_v46  ;;  %1456 = vst [vmem:[%s2124_s8 + $0xb8] sm:$0xff] %v1697_v47 }
 0x1b0   : > { %v728_v48 = vpop.f32.mrf.mxu0  ;;  %v892_v49 = vpop.f32.mrf.mxu1 }
 0x1b1   : > { %783 = vst [vmem:[%s2124_s8 + $0x30] sm:$0xff] %v728_v48  ;;  %1455 = vst [vmem:[%s2124_s8 + $0xb0] sm:$0xff] %v892_v49 }
 0x1b2   : > { %v1672_v50 = vpop.f32.mrf.mxu0  ;;  %v1700_v51 = vpop.f32.mrf.mxu1 }
 0x1b3   : > { %786 = vst [vmem:[%s2124_s8 + $0x48] sm:$0xff] %v1672_v50  ;;  %1458 = vst [vmem:[%s2124_s8 + $0xc8] sm:$0xff] %v1700_v51 }
 0x1b4   : > { %v738_v52 = vpop.f32.mrf.mxu0  ;;  %v902_v53 = vpop.f32.mrf.mxu1 }
 0x1b5   : > { %785 = vst [vmem:[%s2124_s8 + $0x40] sm:$0xff] %v738_v52  ;;  %1457 = vst [vmem:[%s2124_s8 + $0xc0] sm:$0xff] %v902_v53 }
 0x1b6   : > { %v1675_v54 = vpop.f32.mrf.mxu0  ;;  %v1703_v55 = vpop.f32.mrf.mxu1 }
 0x1b7   : > { %788 = vst [vmem:[%s2124_s8 + $0x58] sm:$0xff] %v1675_v54  ;;  %1460 = vst [vmem:[%s2124_s8 + $0xd8] sm:$0xff] %v1703_v55 }
 0x1b8   : > { %v748_v56 = vpop.f32.mrf.mxu0  ;;  %v912_v57 = vpop.f32.mrf.mxu1 }
 0x1b9   : > { %787 = vst [vmem:[%s2124_s8 + $0x50] sm:$0xff] %v748_v56  ;;  %1459 = vst [vmem:[%s2124_s8 + $0xd0] sm:$0xff] %v912_v57 }
 0x1ba   : > { %v1678_v58 = vpop.f32.mrf.mxu0  ;;  %v1706_v59 = vpop.f32.mrf.mxu1 }
 0x1bb   : > { %790 = vst [vmem:[%s2124_s8 + $0x68] sm:$0xff] %v1678_v58  ;;  %1462 = vst [vmem:[%s2124_s8 + $0xe8] sm:$0xff] %v1706_v59 }
 0x1bc   : > { %v758_v60 = vpop.f32.mrf.mxu0  ;;  %v922_v61 = vpop.f32.mrf.mxu1 }
 0x1bd   : > { %789 = vst [vmem:[%s2124_s8 + $0x60] sm:$0xff] %v758_v60  ;;  %1461 = vst [vmem:[%s2124_s8 + $0xe0] sm:$0xff] %v922_v61 }
 0x1be   : > { %v1681_v62 = vpop.f32.mrf.mxu0  ;;  %v1709_v63 = vpop.f32.mrf.mxu1 }
 0x1bf   : > { %792 = vst [vmem:[%s2124_s8 + $0x78] sm:$0xff] %v1681_v62  ;;  %1464 = vst [vmem:[%s2124_s8 + $0xf8] sm:$0xff] %v1709_v63 }
 0x1c0   : > { %v768_v0 = vpop.f32.mrf.mxu0  ;;  %v932_v1 = vpop.f32.mrf.mxu1 }
 0x1c1   : > { %791 = vst [vmem:[%s2124_s8 + $0x70] sm:$0xff] %v768_v0  ;;  %1463 = vst [vmem:[%s2124_s8 + $0xf0] sm:$0xff] %v932_v1 }
 0x1c2   : > { %v1716_v2 = vpop.f32.mrf.mxu0  ;;  %v1744_v3 = vpop.f32.mrf.mxu1 }
 0x1c3   : > { %1482 = vst [vmem:[%s2124_s8 + $0x108] sm:$0xff] %v1716_v2  ;;  %1514 = vst [vmem:[%s2124_s8 + $0x188] sm:$0xff] %v1744_v3 }
 0x1c4   : > { %v1027_v4 = vpop.f32.mrf.mxu0  ;;  %v1192_v5 = vpop.f32.mrf.mxu1 }
 0x1c5   : > { %1481 = vst [vmem:[%s2124_s8 + $0x100] sm:$0xff] %v1027_v4  ;;  %1513 = vst [vmem:[%s2124_s8 + $0x180] sm:$0xff] %v1192_v5 }
 0x1c6   : > { %v1719_v6 = vpop.f32.mrf.mxu0  ;;  %v1747_v7 = vpop.f32.mrf.mxu1 }
 0x1c7   : > { %1484 = vst [vmem:[%s2124_s8 + $0x118] sm:$0xff] %v1719_v6  ;;  %1516 = vst [vmem:[%s2124_s8 + $0x198] sm:$0xff] %v1747_v7 }
 0x1c8   : > { %v1037_v8 = vpop.f32.mrf.mxu0  ;;  %v1202_v9 = vpop.f32.mrf.mxu1 }
 0x1c9   : > { %1483 = vst [vmem:[%s2124_s8 + $0x110] sm:$0xff] %v1037_v8  ;;  %1515 = vst [vmem:[%s2124_s8 + $0x190] sm:$0xff] %v1202_v9 }
 0x1ca   : > { %v1722_v10 = vpop.f32.mrf.mxu0  ;;  %v1750_v11 = vpop.f32.mrf.mxu1 }
 0x1cb   : > { %1486 = vst [vmem:[%s2124_s8 + $0x128] sm:$0xff] %v1722_v10  ;;  %1518 = vst [vmem:[%s2124_s8 + $0x1a8] sm:$0xff] %v1750_v11 }
 0x1cc   : > { %v1047_v12 = vpop.f32.mrf.mxu0  ;;  %v1212_v13 = vpop.f32.mrf.mxu1 }
 0x1cd   : > { %1485 = vst [vmem:[%s2124_s8 + $0x120] sm:$0xff] %v1047_v12  ;;  %1517 = vst [vmem:[%s2124_s8 + $0x1a0] sm:$0xff] %v1212_v13 }
 0x1ce   : > { %v1725_v14 = vpop.f32.mrf.mxu0  ;;  %v1753_v15 = vpop.f32.mrf.mxu1 }
 0x1cf   : > { %1488 = vst [vmem:[%s2124_s8 + $0x138] sm:$0xff] %v1725_v14  ;;  %1520 = vst [vmem:[%s2124_s8 + $0x1b8] sm:$0xff] %v1753_v15 }
 0x1d0   : > { %v1057_v16 = vpop.f32.mrf.mxu0  ;;  %v1222_v17 = vpop.f32.mrf.mxu1 }
 0x1d1   : > { %1487 = vst [vmem:[%s2124_s8 + $0x130] sm:$0xff] %v1057_v16  ;;  %1519 = vst [vmem:[%s2124_s8 + $0x1b0] sm:$0xff] %v1222_v17 }
 0x1d2   : > { %v1728_v18 = vpop.f32.mrf.mxu0  ;;  %v1756_v19 = vpop.f32.mrf.mxu1 }
 0x1d3   : > { %1490 = vst [vmem:[%s2124_s8 + $0x148] sm:$0xff] %v1728_v18  ;;  %1522 = vst [vmem:[%s2124_s8 + $0x1c8] sm:$0xff] %v1756_v19 }
 0x1d4   : > { %v1067_v20 = vpop.f32.mrf.mxu0  ;;  %v1232_v21 = vpop.f32.mrf.mxu1 }
 0x1d5   : > { %1489 = vst [vmem:[%s2124_s8 + $0x140] sm:$0xff] %v1067_v20  ;;  %1521 = vst [vmem:[%s2124_s8 + $0x1c0] sm:$0xff] %v1232_v21 }
 0x1d6   : > { %v1731_v22 = vpop.f32.mrf.mxu0  ;;  %v1759_v23 = vpop.f32.mrf.mxu1 }
 0x1d7   : > { %1492 = vst [vmem:[%s2124_s8 + $0x158] sm:$0xff] %v1731_v22  ;;  %1524 = vst [vmem:[%s2124_s8 + $0x1d8] sm:$0xff] %v1759_v23 }
 0x1d8   : > { %v1077_v24 = vpop.f32.mrf.mxu0  ;;  %v1242_v25 = vpop.f32.mrf.mxu1 }
 0x1d9   : > { %1491 = vst [vmem:[%s2124_s8 + $0x150] sm:$0xff] %v1077_v24  ;;  %1523 = vst [vmem:[%s2124_s8 + $0x1d0] sm:$0xff] %v1242_v25 }
 0x1da   : > { %v1734_v26 = vpop.f32.mrf.mxu0  ;;  %v1762_v27 = vpop.f32.mrf.mxu1 }
 0x1db   : > { %1494 = vst [vmem:[%s2124_s8 + $0x168] sm:$0xff] %v1734_v26  ;;  %1526 = vst [vmem:[%s2124_s8 + $0x1e8] sm:$0xff] %v1762_v27 }
 0x1dc   : > { %v1087_v28 = vpop.f32.mrf.mxu0  ;;  %v1252_v29 = vpop.f32.mrf.mxu1 }
 0x1dd   : > { %1493 = vst [vmem:[%s2124_s8 + $0x160] sm:$0xff] %v1087_v28  ;;  %1525 = vst [vmem:[%s2124_s8 + $0x1e0] sm:$0xff] %v1252_v29 }
 0x1de   : > { %v1737_v30 = vpop.f32.mrf.mxu0  ;;  %v1765_v31 = vpop.f32.mrf.mxu1 }
 0x1df   : > { %1496 = vst [vmem:[%s2124_s8 + $0x178] sm:$0xff] %v1737_v30  ;;  %1528 = vst [vmem:[%s2124_s8 + $0x1f8] sm:$0xff] %v1765_v31 }
 0x1e0   : > { %v1097_v32 = vpop.f32.mrf.mxu0  ;;  %v1262_v33 = vpop.f32.mrf.mxu1 }
 0x1e1   : > { %1495 = vst [vmem:[%s2124_s8 + $0x170] sm:$0xff] %v1097_v32  ;;  %1527 = vst [vmem:[%s2124_s8 + $0x1f0] sm:$0xff] %v1262_v33 }
 0x1e2   : > { %1836 = shalt.err (!%p1833_p5)
}
 0x1e3   : > { %s1837_s28 = scalar_lea.hbm %s2191_s19, 8192  ;;  %s1841_s4 = scalar_lea.hbm %s2249_s3, 16384 }
 0x1e4   : > { %p1838_p6 = scmp.ne.s32.totalorder %s2191_s19, %s1837_s28  ;;  %p1842_p10 = scmp.lt.s32.totalorder %s2191_s19, %s2249_s3 }
 0x1e5   : > { %p1843_p11 = scmp.lt.s32.totalorder %s1841_s4, %s1837_s28 }
 0x1e6   : > { %p1839_p7 = pnand %p1838_p6, %p1964_p4 }
 0x1e7   : > { %p1844_p12 = por %p1843_p11, %p1842_p10 }
 0x1e8   : > { %p1840_p9 = pneg %p1839_p7 }
 0x1ea   : > { %p1845_p13 = pnand %p1844_p12, %p1840_p9 }
 0x1ec   : > { %1848 = shalt.err (!%p1845_p13)
}
 0x1ed   : > { %s1902_s7 = smov 128   ;;  %s1903_s8 = smov 8  }
 0x1ee   : > { %1766 = dma.vmem_to_hbm [thread:$0]  (%p1964_p4), %s2193_s10, 8192, %s2191_s19, %s2201_s15, %s1902_s7, %s1902_s7, %s1903_s8  }
 0x1ef PF: > { %p1772_p0 = scmp.ge.s32.totalorder %s1899_s17, 2  ;;  %s1320_s9 = sand.u32 1, %s1879_s12  }
 0x1f0   : > { %s1321_s11 = scalar_lea.sflag [#allocation4], %s1320_s9 }
 0x1f1   : > { %p1769_p1 = pnand %p1772_p0, %p1971_p8 }
 0x1f3   : > { %p1770_p2 = pneg %p1769_p1 }
 0x1f5   : > { %1874 = dma.done.wait (%p1770_p2), %s1321_s11, 8192  }
 0x1f6   : > { %1876 = vsyncadd (%p1770_p2), %s1321_s11, 4294959104  ;;  %s16_s17 = sadd.s32 1, %s1899_s17   ;;  %s2252_s12 = smov %s1883_s13 }
 0x1f7   : > { %p13_p3 = scmp.ge.s32.totalorder %s16_s17, 4   ;;  %s2253_s13 = smov %s1887_s14 }
 0x1f8   : > { %s2254_s14 = smov %s1977_s25  ;;  %s2255_s15 = smov %s1895_s16 }
 0x1f9   : > { %s2256_s16 = smov %s2258_s20  ;;  %15 = sbr.rel (!%p13_p3) target bundleno = 4 (0x4), region = 86 }
 0x1fe   :  { %1326 = vsyncpa [#allocation4], 1 }
 0x1ff   :  { %1328 = vsyncpa [#allocation4 + $0x1], 1 }

</bundles_post_ra>
